<compile_context>
chip_gen: v7x
topology: tpu7x:2x2x1
jax: 0.10.0
libtpu: 0.0.40
codegen_flags: <defaults>
</compile_context>

<pallas_src>
import jax
import jax.numpy as jnp
from jax.experimental import pallas as pl
from jax.experimental.pallas import tpu as pltpu


def _linear_kernel(x_ref, w_ref, b_ref, o_ref):
    # x_ref: (TB, D) VMEM tile
    # w_ref: (1, D)  VMEM (constant block, resident across grid steps)
    # b_ref: (1,)    SMEM scalar
    # o_ref: (1, TB) lane-dense output tile
    acc = jax.lax.dot_general(
        w_ref[...],
        x_ref[...],
        # Contract on D of both operands (A·Bᵀ form, like flash-attn q·kᵀ):
        # Mosaic drives the MXU with x in its natural (TB, D) layout, no
        # materialized transpose of the big tile.
        dimension_numbers=(((1,), (1,)), ((), ())),
        preferred_element_type=jnp.float32,
    )  # -> (1, TB) f32
    o_ref[...] = (acc + b_ref[0]).astype(o_ref.dtype)


def _x_buffer_target_bytes():
    """~8 MiB per x buffer; clamp against the actual VMEM of this chip."""
    try:
        cap = pltpu.get_tpu_info().vmem_capacity_bytes
    except Exception:  # query unavailable -> assume the smallest (v7x, 64 MiB)
        cap = 64 * 1024 * 1024
    return int(min(8 * 1024 * 1024, cap // 6))


def _pick_batch_tile(batch, dim, target_bytes):
    """Batch tile: multiple-of-128 rows giving ~target_bytes of f32 x per buffer."""
    tb = max(128, (target_bytes // max(1, dim * 4)) // 128 * 128)
    # Keep >= 2 tiles so v7x's two TensorCores both get work (neutral on 1-TC).
    if batch >= 256:
        half = ((-(-batch // 2)) + 127) // 128 * 128  # ceil(batch/2) -> mult of 128
        tb = min(tb, half)
    if tb >= batch:
        return batch  # single exact full-dim block; no padding, no edge masking
    return tb


def linear_forward(x, weight, bias):
    """y = x @ weight.T + bias, matching torch.nn.Linear(dim, 1).

    x:      (B, D) float32
    weight: (1, D) float32   (PyTorch layout, used as-is — no transpose needed)
    bias:   (1,)   float32
    returns (B, 1) float32
    """
    B, D = x.shape
    TB = _pick_batch_tile(B, D, _x_buffer_target_bytes())
    num_tiles = pl.cdiv(B, TB)

    itemsize = jnp.dtype(x.dtype).itemsize
    vmem_limit = int(
        2 * TB * D * itemsize      # double-buffered x tiles
        + 2 * TB * itemsize        # double-buffered (1, TB) output rows
        + 2 * D * itemsize         # resident weight (+ headroom for its buffer)
        + (2 << 20)                # slack for compiler scratch
    )
    vmem_limit = max(vmem_limit, 16 << 20)

    out = pl.pallas_call(
        _linear_kernel,
        out_shape=jax.ShapeDtypeStruct((1, B), x.dtype),
        grid_spec=pltpu.PrefetchScalarGridSpec(
            num_scalar_prefetch=0,
            grid=(num_tiles,),
            in_specs=[
                pl.BlockSpec((TB, D), lambda i: (i, 0)),             # x tile
                pl.BlockSpec((1, D), lambda i: (0, 0)),              # weight (resident)
                pl.BlockSpec(memory_space=pltpu.MemorySpace.SMEM),   # bias scalar
            ],
            out_specs=pl.BlockSpec((1, TB), lambda i: (0, i)),       # lane-dense row
        ),
        compiler_params=pltpu.CompilerParams(
            dimension_semantics=("parallel",),   # independent batch tiles (v7x 2-TC)
            vmem_limit_bytes=vmem_limit,
        ),
    )(x, weight, bias)

    # Back to PyTorch's (B, 1) layout (cheap XLA reshape outside the kernel).
    return out.reshape(B, 1)


if __name__ == "__main__":
    key = jax.random.PRNGKey(0)
    k_x, k_w, k_b = jax.random.split(key, 3)

    # Small demo shapes consistent with the module: nn.Linear(dim, 1).
    batch, dim = 8, 32

    # Deterministic param init mimicking nn.Linear: U(-1/sqrt(dim), 1/sqrt(dim))
    bound = 1.0 / (dim ** 0.5)
    weight = jax.random.uniform(k_w, (1, dim), jnp.float32, -bound, bound)
    bias = jax.random.uniform(k_b, (1,), jnp.float32, -bound, bound)

    x = jax.random.normal(k_x, (batch, dim), dtype=jnp.float32)
    y = jax.block_until_ready(linear_forward(x, weight, bias))
    y_ref = x @ weight.T + bias
    assert y.shape == (batch, 1)
    assert jnp.allclose(y, y_ref, atol=1e-5, rtol=1e-5)

    # Also exercise the multi-tile + ragged-last-tile path (no pad; Pallas
    # masks the OOB lanes of the final partial output block).
    batch2 = 300
    x2 = jax.random.normal(k_x, (batch2, dim), dtype=jnp.float32)
    y2 = jax.block_until_ready(linear_forward(x2, weight, bias))
    y2_ref = x2 @ weight.T + bias
    assert y2.shape == (batch2, 1)
    assert jnp.allclose(y2, y2_ref, atol=1e-5, rtol=1e-5)

    print("KERNEL_OK")
</pallas_src>

<mosaic_0001>
module attributes {stable_mosaic.version = 11 : i64} {
  func.func @_linear_kernel(%arg0: i32, %arg1: memref<8x32xf32, #tpu.memory_space<vmem>>, %arg2: memref<1x32xf32, #tpu.memory_space<vmem>>, %arg3: memref<1xf32, #tpu.memory_space<smem>>, %arg4: memref<1x8xf32, #tpu.memory_space<vmem>>) attributes {dimension_semantics = [#tpu.dimension_semantics<parallel>], iteration_bounds = array<i64: 1>, scalar_prefetch = 0 : i64, scratch_operands = 0 : i64, tpu.core_type = #tpu.core_type<tc>, window_params = [{transform_indices = @transform_0, window_bounds = array<i64: 8, 32>}, {pipeline_mode = #tpu.pipeline_mode<synchronous>, transform_indices = @transform_1, window_bounds = array<i64: 1, 32>}, {transform_indices = @transform_2, window_bounds = array<i64: 1>}, {transform_indices = @transform_3, window_bounds = array<i64: 1, 8>}]} {
    %c0 = arith.constant 0 : index
    %c0_0 = arith.constant 0 : index
    %0 = vector.load %arg2[%c0, %c0_0] : memref<1x32xf32, #tpu.memory_space<vmem>>, vector<1x32xf32>
    %c0_1 = arith.constant 0 : index
    %c0_2 = arith.constant 0 : index
    %1 = vector.load %arg1[%c0_1, %c0_2] : memref<8x32xf32, #tpu.memory_space<vmem>>, vector<8x32xf32>
    %cst = arith.constant dense<0.000000e+00> : vector<1x8xf32>
    %2 = tpu.matmul %0, %1, %cst {dimension_numbers = #tpu.dot_dimension_numbers<[1], [1], [0], [0], [0, 0, 1, 0], [], []>} : vector<1x32xf32>, vector<8x32xf32>, vector<1x8xf32> -> vector<1x8xf32>
    %c0_3 = arith.constant 0 : index
    %3 = memref.load %arg3[%c0_3] : memref<1xf32, #tpu.memory_space<smem>>
    %4 = vector.broadcast %3 : f32 to vector<1x8xf32>
    %5 = arith.addf %2, %4 : vector<1x8xf32>
    %c0_4 = arith.constant 0 : index
    %c0_5 = arith.constant 0 : index
    %6 = vector.load %arg4[%c0_4, %c0_5] : memref<1x8xf32, #tpu.memory_space<vmem>>, vector<1x8xf32>
    tpu.vector_store %arg4[%c0_4, %c0_5], %5 {strides = array<i32>} : memref<1x8xf32, #tpu.memory_space<vmem>>, vector<1x8xf32>,
    return
  }
  func.func @transform_0(%arg0: i32) -> (i32, i32) {
    %c0_i32 = arith.constant 0 : i32
    %c0_i32_0 = arith.constant 0 : i32
    return %arg0, %c0_i32 : i32, i32
  }
  func.func @transform_1(%arg0: i32) -> (i32, i32) {
    %c0_i32 = arith.constant 0 : i32
    %c0_i32_0 = arith.constant 0 : i32
    %c0_i32_1 = arith.constant 0 : i32
    return %c0_i32, %c0_i32_0 : i32, i32
  }
  func.func @transform_2(%arg0: i32) -> i32 {
    %c0_i32 = arith.constant 0 : i32
    %c0_i32_0 = arith.constant 0 : i32
    return %c0_i32 : i32
  }
  func.func @transform_3(%arg0: i32) -> (i32, i32) {
    %c0_i32 = arith.constant 0 : i32
    %c0_i32_0 = arith.constant 0 : i32
    return %c0_i32, %arg0 : i32, i32
  }
}

</mosaic_0001>

<bundles_post_ra>
// kernel: tpu_custom_call.1
= control target key start
LH: loop header
LB: loop body
LE: loop exit
PB: predicated region body
PF: predicated region fallthrough
CT: control target
= control target key end

     0   :  { %9 = vsyncpa [#allocation4], 0  ;;  %s241_s0 = inlined_call_operand.hbm [shape: f32[8,32], index: 0, kind: input, shape index: {}]   ;;  %s242_s1 = inlined_call_operand.vmem [shape: f32[1,32], index: 1, kind: input, shape index: {}]   ;;  %s243_s2 = inlined_call_operand.<no memory space> [shape: f32[1], index: 2, kind: input, shape index: {}]   ;;  %s244_s3 = inlined_call_operand.hbm [shape: f32[1,8], index: 3, kind: output, shape index: {}]  }
   0x1   :  { %10 = vsyncpa [#allocation5], 0  ;;  %s187_s12 = smov [#allocation3]   ;;  %s139_s16 = scalar_lea.hbm %s241_s0, 128 }
   0x2   :  { %s17_s13 = sshll.u32 %s187_s12, 4  ;;  %p140_p0 = scmp.ne.s32.totalorder %s241_s0, %s139_s16  ;;  %s18_s13 = int_to_ptr.vmem [resolvable:$true] %s17_s13 }
   0x3   :  { %p143_p1 = scmp.lt.u32.totalorder %s139_s16, %s241_s0 }
   0x5   :  { %p145_p2 = pnand %p143_p1, %p140_p0 }
   0x7   :  { %148 = shalt.err (!%p145_p2)
}
   0x8   :  { %s149_s21 = scalar_lea.vmem %s18_s13, 128  ;;  %p154_p4 = scmp.lt.s32.totalorder %s18_s13, %s18_s13 }
   0x9   :  { %p150_p3 = scmp.ne.s32.totalorder %s18_s13, %s149_s21  ;;  %p155_p5 = scmp.lt.s32.totalorder %s149_s21, %s149_s21 }
   0xb   :  { %p156_p6 = por %p155_p5, %p154_p4 }
   0xd   :  { %p157_p7 = pnand %p156_p6, %p150_p3 }
   0xf   :  { %160 = shalt.err (!%p157_p7)
}
  0x10   :  { %20 = dma.hbm_to_vmem [thread:$0]  %s241_s0, 128, %s18_s13, [#allocation4]  }
  0x11   :  { %183 = dma.done.wait [#allocation4], 128  }
  0x12   :  { %184 = vsyncadd [#allocation4], 4294967168  ;;  %v188_v0 = vmov 0.0   ;;  %vm189_vm0 = vmmov 0   ;;  %vm32_vm1 = vcmask 261120   ;;  %v29_v1 = vld [vmem:[#allocation3] sm:$0xff]  ;;  %v31_v3 = vstv %s243_s2 }
  0x13   :  { %130 = vmatprep.subr.mxu0 %v188_v0  ;;  %132 = vmatprep.mubr.msk.f32.mxu0 %vm189_vm0, %v188_v0  ;;  %v28_v2 = vld [vmem:[%s242_s1] sm:$0x1]  ;;  %s190_s28 = smov [#allocation6]   ;;  %vm109_vm2 = vcmask 57344  }
  0x14   :  { %131 = vmatpush3.xpose.msk.msra.mxu0 %vm32_vm1, %v29_v1  ;;  %s117_s0 = sshll.u32 %s190_s28, 4  ;;  %s118_s0 = int_to_ptr.vmem [resolvable:$true] %s117_s0 }
  0x15   :  { %s161_s29 = scalar_lea.vmem %s118_s0, 16  ;;  %s165_s30 = scalar_lea.vmem %s118_s0, 32 }
  0x16   :  { %p162_p8 = scmp.ne.s32.totalorder %s118_s0, %s161_s29  ;;  %p166_p9 = scmp.lt.s32.totalorder %s118_s0, %s118_s0 }
  0x17   :  { %133 = vmatmul.mubr.msk.f32.vlgmr.msra.gmra.mrb[0].mxu0 %vm32_vm1, %v28_v2  ;;  %p167_p10 = scmp.lt.s32.totalorder %s165_s30, %s161_s29 }
  0x19   :  { %p168_p11 = por %p167_p10, %p166_p9 }
  0x1b   :  { %p169_p12 = pnand %p168_p11, %p162_p8 }
  0xea   :  { %v105_v4 = vpop.f32.mrb[0].mxu0 }
  0xeb   :  { %v106_v5 = vadd.f32 %v105_v4, %v31_v3  ;;  %v134_v6 = vpop.f32.mrb[1].mxu0 }
  0xed   :  { %110 = vst.msk [vmem:[#allocation6] sm:$0x1] %vm109_vm2, %v106_v5 }
  0xee   :  { %172 = shalt.err (!%p169_p12)
}
  0xef   :  { %s173_s2 = scalar_lea.hbm %s244_s3, 16 }
  0xf0   :  { %p174_p13 = scmp.ne.s32.totalorder %s244_s3, %s173_s2  ;;  %p177_p0 = scmp.lt.u32.totalorder %s173_s2, %s244_s3 }
  0xf2   :  { %p179_p1 = pnand %p177_p0, %p174_p13 }
  0xf4   :  { %182 = shalt.err (!%p179_p1)
}
  0xf5   :  { %120 = dma.vmem_to_hbm [thread:$0]  %s118_s0, 16, %s244_s3, [#allocation5]  }
  0xf6   :  { %185 = dma.done.wait [#allocation5], 16  }
  0xf7   :  { %186 = vsyncadd [#allocation5], 4294967280 }
  0xf8   :  { %124 = vsyncpa [#allocation4], 1 }
  0xf9   :  { %125 = vsyncpa [#allocation5], 1 }

</bundles_post_ra>
